<compile_context>
chip_gen: v6e
topology: v6e:2x2x1
jax: 0.10.0
libtpu: 0.0.40
codegen_flags: <defaults>
</compile_context>

<pallas_src>
import jax
import jax.numpy as jnp
from jax.experimental import pallas as pl
from jax.experimental.pallas import tpu as pltpu


def _mfm_kernel(x_ref, o_ref):
    # x_ref: (bn, 2, br, 128) -- both channel halves of bn batch elements
    # o_ref: (bn, 1, br, 128) -- elementwise max of the two halves (pure VPU work)
    o_ref[:, 0] = jnp.maximum(x_ref[:, 0], x_ref[:, 1])


def max_feature_map_21(x: jax.Array, *, target_block_bytes: int = 2 * 1024 * 1024) -> jax.Array:
    """MFM 2/1 on an NCHW tensor: out[n, c] = max(x[n, c], x[n, c + C//2])."""
    n, c, h, w = x.shape
    assert c % 2 == 0, "channel dim must be even"
    ch = c // 2
    L = ch * h * w
    itemsize = jnp.dtype(x.dtype).itemsize

    # Sublane packing granularity: 8 rows/vreg at 32-bit, 16 at 16-bit, 32 at 8-bit.
    sub = max(8, 32 // itemsize)

    # Lane-pad the flattened half-channel axis to a multiple of 128 so the last
    # block dim is a dense 128-lane tile (unmasked vld/vst).  The reshape is
    # zero-copy; the pad only materializes when L is not already 128-aligned.
    Lp = pl.cdiv(L, 128) * 128
    R = Lp // 128
    x3 = x.reshape(n, 2, L)
    if Lp != L:
        x3 = jnp.pad(x3, ((0, 0), (0, 0), (0, Lp - L)))
    x4 = x3.reshape(n, 2, R, 128)

    total_bytes = n * 2 * Lp * itemsize
    if total_bytes <= 512 * 1024:
        # Tiny activation: a single grid step (per-step overhead would dominate).
        bn, br = n, R
    else:
        # Rows per step targeting ~target_block_bytes of input per grid step.
        rows_budget = max(sub, (target_block_bytes // (2 * 128 * itemsize)) // sub * sub)
        if R > rows_budget:
            bn, br = 1, rows_budget          # tile the row axis (ragged tail is masked)
        else:
            # One batch element fits in a step -> group batches to MiB-scale slabs.
            br = R
            bn = min(n, max(1, target_block_bytes // (2 * Lp * itemsize)))
            if bn >= n:
                # Keep at least 2 grid steps so v7x's 2nd TensorCore is not idle.
                if n >= 2:
                    bn = (n + 1) // 2
                elif R >= 2 * sub:
                    br = max(sub, ((R // 2) // sub) * sub)

    grid = (pl.cdiv(n, bn), pl.cdiv(R, br))

    out4 = pl.pallas_call(
        _mfm_kernel,
        out_shape=jax.ShapeDtypeStruct((n, 1, R, 128), x.dtype),
        grid_spec=pltpu.PrefetchScalarGridSpec(
            num_scalar_prefetch=0,
            grid=grid,
            in_specs=[
                # One operand, both halves: block index (i, 0, j, 0).
                pl.BlockSpec((bn, 2, br, 128), lambda i, j: (i, 0, j, 0)),
            ],
            out_specs=pl.BlockSpec((bn, 1, br, 128), lambda i, j: (i, 0, j, 0)),
        ),
        compiler_params=pltpu.CompilerParams(
            # Both axes independent -> shard across TensorCores on v7x;
            # harmless serial loop on single-TC v5e/v6e.
            dimension_semantics=("parallel", "parallel"),
        ),
        cost_estimate=pl.CostEstimate(
            flops=n * L,
            bytes_accessed=n * 2 * L * itemsize + n * L * itemsize,
            transcendentals=0,
        ),
    )(x4)

    return out4.reshape(n, Lp)[:, :L].reshape(n, ch, h, w)


if __name__ == "__main__":
    key = jax.random.PRNGKey(0)

    # Lane-aligned case (LCNN-style): batch=2, channels=4, 16x16 spatial (L=512).
    x = jax.random.normal(key, (2, 4, 16, 16), dtype=jnp.float32)
    out = jax.block_until_ready(max_feature_map_21(x))
    ref = jnp.maximum(x[:, :2], x[:, 2:])
    assert out.shape == (2, 2, 16, 16)
    assert jnp.allclose(out, ref), "mismatch vs reference (aligned case)"

    # Non-128-aligned tail: channels=6, 5x7 spatial (L = 3*5*7 = 105) exercises
    # the lane-padding path flagged in the review.
    x2 = jax.random.normal(jax.random.PRNGKey(1), (2, 6, 5, 7), dtype=jnp.float32)
    out2 = jax.block_until_ready(max_feature_map_21(x2))
    ref2 = jnp.maximum(x2[:, :3], x2[:, 3:])
    assert out2.shape == (2, 3, 5, 7)
    assert jnp.allclose(out2, ref2), "mismatch vs reference (ragged case)"

    print("KERNEL_OK")
</pallas_src>

<mosaic_0001>
module attributes {stable_mosaic.version = 11 : i64} {
  func.func @_mfm_kernel(%arg0: i32, %arg1: i32, %arg2: memref<2x2x4x128xf32, #tpu.memory_space<vmem>>, %arg3: memref<2x1x4x128xf32, #tpu.memory_space<vmem>>) attributes {dimension_semantics = [#tpu.dimension_semantics<parallel>, #tpu.dimension_semantics<parallel>], iteration_bounds = array<i64: 1, 1>, scalar_prefetch = 0 : i64, scratch_operands = 0 : i64, tpu.core_type = #tpu.core_type<tc>, window_params = [{transform_indices = @transform_0, window_bounds = array<i64: 2, 2, 4, 128>}, {transform_indices = @transform_1, window_bounds = array<i64: 2, 1, 4, 128>}]} {
    %c0 = arith.constant 0 : index
    %c0_0 = arith.constant 0 : index
    %c0_1 = arith.constant 0 : index
    %c0_2 = arith.constant 0 : index
    %0 = vector.load %arg2[%c0, %c0_0, %c0_1, %c0_2] : memref<2x2x4x128xf32, #tpu.memory_space<vmem>>, vector<2x1x4x128xf32>
    %1 = vector.shape_cast %0 : vector<2x1x4x128xf32> to vector<2x4x128xf32>
    %c0_3 = arith.constant 0 : index
    %c1 = arith.constant 1 : index
    %c0_4 = arith.constant 0 : index
    %c0_5 = arith.constant 0 : index
    %2 = vector.load %arg2[%c0_3, %c1, %c0_4, %c0_5] : memref<2x2x4x128xf32, #tpu.memory_space<vmem>>, vector<2x1x4x128xf32>
    %3 = vector.shape_cast %2 : vector<2x1x4x128xf32> to vector<2x4x128xf32>
    %4 = arith.maximumf %1, %3 : vector<2x4x128xf32>
    %c0_6 = arith.constant 0 : index
    %c0_7 = arith.constant 0 : index
    %c0_8 = arith.constant 0 : index
    %c0_9 = arith.constant 0 : index
    %5 = vector.load %arg3[%c0_6, %c0_7, %c0_8, %c0_9] : memref<2x1x4x128xf32, #tpu.memory_space<vmem>>, vector<2x1x4x128xf32>
    %6 = vector.shape_cast %5 : vector<2x1x4x128xf32> to vector<2x4x128xf32>
    %7 = vector.shape_cast %4 : vector<2x4x128xf32> to vector<2x1x4x128xf32>
    tpu.vector_store %arg3[%c0_6, %c0_7, %c0_8, %c0_9], %7 {strides = array<i32>} : memref<2x1x4x128xf32, #tpu.memory_space<vmem>>, vector<2x1x4x128xf32>,
    return
  }
  func.func @transform_0(%arg0: i32, %arg1: i32) -> (i32, i32, i32, i32) {
    %c0_i32 = arith.constant 0 : i32
    %c0_i32_0 = arith.constant 0 : i32
    %c0_i32_1 = arith.constant 0 : i32
    return %arg0, %c0_i32, %arg1, %c0_i32_0 : i32, i32, i32, i32
  }
  func.func @transform_1(%arg0: i32, %arg1: i32) -> (i32, i32, i32, i32) {
    %c0_i32 = arith.constant 0 : i32
    %c0_i32_0 = arith.constant 0 : i32
    %c0_i32_1 = arith.constant 0 : i32
    return %arg0, %c0_i32, %arg1, %c0_i32_0 : i32, i32, i32, i32
  }
}

</mosaic_0001>

<bundles_post_ra>
// kernel: tpu_custom_call.1
= control target key start
LH: loop header
LB: loop body
LE: loop exit
PB: predicated region body
PF: predicated region fallthrough
CT: control target
= control target key end

     0   :  { %6 = vsyncpa [#allocation3], 0  ;;  %s117_s0 = inlined_call_operand.hbm [shape: f32[2,2,4,128], index: 0, kind: input, shape index: {}]   ;;  %s118_s1 = inlined_call_operand.hbm [shape: f32[2,1,4,128], index: 1, kind: output, shape index: {}]  }
   0x1   :  { %7 = vsyncpa [#allocation4], 0  ;;  %s97_s6 = smov [#allocation2]  }
   0x2   :  { %s13_s7 = sshll.u32 %s97_s6, 4  ;;  %s14_s7 = int_to_ptr.vmem [resolvable:$true] %s13_s7 }
   0x3   :  { %s61_s8 = scalar_lea.vmem %s14_s7, 256  ;;  %p66_p1 = scmp.lt.s32.totalorder %s14_s7, %s14_s7 }
   0x4   :  { %p62_p0 = scmp.ne.s32.totalorder %s14_s7, %s61_s8  ;;  %p67_p2 = scmp.lt.s32.totalorder %s61_s8, %s61_s8 }
   0x6   :  { %p68_p3 = por %p67_p2, %p66_p1 }
   0x8   :  { %p69_p4 = pnand %p68_p3, %p62_p0 }
   0xa   :  { %72 = shalt.err (!%p69_p4)
}
   0xb   :  { %s98_s9 = smov 64   ;;  %s99_s10 = smov 4  }
   0xc   :  { %19 = dma.hbm_to_vmem [thread:$0]  %s117_s0, 256, %s14_s7, [#allocation3], %s98_s9, %s98_s9, %s99_s10  }
   0xd   :  { %93 = dma.done.wait [#allocation3], 256  }
   0xe   :  { %94 = vsyncadd [#allocation3], 4294967040  ;;  %s100_s13 = smov [#allocation5]   ;;  %v23_v0 = vld [vmem:[#allocation2] sm:$0xf] }
   0xf   :  { %s37_s14 = sshll.u32 %s100_s13, 4  ;;  %v26_v1 = vld [vmem:[#allocation2 + $0x4] sm:$0xf]  ;;  %v24_v2 = vld [vmem:[#allocation2 + $0x8] sm:$0xf]  ;;  %s38_s14 = int_to_ptr.vmem [resolvable:$true] %s37_s14 }
  0x10   :  { %v28_v3 = vmax.f32 %v23_v0, %v26_v1  ;;  %v27_v4 = vld [vmem:[#allocation2 + $0xc] sm:$0xf]  ;;  %s73_s15 = scalar_lea.vmem %s38_s14, 128  ;;  %p78_p6 = scmp.lt.s32.totalorder %s38_s14, %s38_s14 }
  0x11   :  { %v29_v5 = vmax.f32 %v24_v2, %v27_v4  ;;  %p74_p5 = scmp.ne.s32.totalorder %s38_s14, %s73_s15  ;;  %p79_p7 = scmp.lt.s32.totalorder %s73_s15, %s73_s15 }
  0x12   :  { %30 = vst [vmem:[#allocation5] sm:$0xf] %v28_v3 }
  0x13   :  { %31 = vst [vmem:[#allocation5 + $0x4] sm:$0xf] %v29_v5  ;;  %p80_p8 = por %p79_p7, %p78_p6 }
  0x15   :  { %p81_p9 = pnand %p80_p8, %p74_p5 }
  0x17   :  { %84 = shalt.err (!%p81_p9)
}
  0x18   :  { %43 = dma.vmem_to_hbm [thread:$0]  %s38_s14, 128, %s118_s1, [#allocation4], %s98_s9, %s98_s9, %s99_s10  }
  0x19   :  { %95 = dma.done.wait [#allocation4], 128  }
  0x1a   :  { %96 = vsyncadd [#allocation4], 4294967168 }
  0x1b   :  { %47 = vsyncpa [#allocation3], 1 }
  0x1c   :  { %48 = vsyncpa [#allocation4], 1 }

</bundles_post_ra>
